<compile_context>
chip_gen: v5e
topology: v5e:2x2
jax: 0.10.0
libtpu: 0.0.40
codegen_flags: <defaults>
</compile_context>

<pallas_src>
import functools

import jax
import jax.numpy as jnp
from jax.experimental import pallas as pl
from jax.experimental.pallas import tpu as pltpu


def _dot_kernel_single(e1_ref, e2_ref, o_ref):
    # Full embedding dim resident in one block: reduce over sublanes,
    # lane-dense store of the (1, TN) result slab.
    e1 = e1_ref[...].astype(jnp.float32)
    e2 = e2_ref[...].astype(jnp.float32)
    o_ref[...] = jnp.sum(e1 * e2, axis=0, keepdims=True).astype(o_ref.dtype)


def _dot_kernel_tiled(e1_ref, e2_ref, o_ref, acc_ref, *, d_total, td):
    # D is tiled along the trailing ("arbitrary") grid axis; accumulate in f32.
    k = pl.program_id(1)

    @pl.when(k == 0)
    def _():
        acc_ref[...] = jnp.zeros_like(acc_ref)

    prod = e1_ref[...].astype(jnp.float32) * e2_ref[...].astype(jnp.float32)
    if d_total % td != 0:
        # Ragged last D block: zero sublanes past the true embedding dim so
        # padded garbage never enters the reduction.
        d0 = k * td
        row = jax.lax.broadcasted_iota(jnp.int32, prod.shape, 0) + d0
        prod = jnp.where(row < d_total, prod, 0.0)
    acc_ref[...] += jnp.sum(prod, axis=0, keepdims=True)

    @pl.when(k == pl.num_programs(1) - 1)
    def _():
        o_ref[...] = acc_ref[...].astype(o_ref.dtype)


def _pick_tiles(D, N, itemsize, *, tn=None,
                vmem_budget_bytes=16 * 1024 * 1024, tn_cap=8192):
    """Pick (td, tn): largest lane tile keeping 2 inputs x 2 buffers in budget;
    only tile D (reduction axis) if the full embedding dim can't fit."""
    n_padded = pl.cdiv(N, 128) * 128
    sub = 8 * max(1, 4 // max(1, itemsize))  # sublane multiple incl. packing

    if tn is None:
        tn = vmem_budget_bytes // (4 * max(D, 1) * itemsize)
        tn = (tn // 128) * 128
        if tn >= 128:
            tn = min(tn_cap, tn, n_padded)
            if n_padded >= 256 and pl.cdiv(n_padded, tn) < 2:
                # Keep >= 2 grid steps so megacore / pipelining has work.
                tn = max(128, ((n_padded // 2) // 128) * 128)
        else:
            tn = 128

    if 4 * D * tn * itemsize <= vmem_budget_bytes:
        return D, tn  # common case: whole embedding dim in one block

    td = vmem_budget_bytes // (4 * tn * itemsize)
    td = max(sub, (td // sub) * sub)
    td = min(td, ((D + sub - 1) // sub) * sub)
    return td, tn


def dot_product_edge_decoder(embeds1, embeds2, rel=None, *, tn=None,
                             vmem_budget_bytes=16 * 1024 * 1024):
    """sum(embeds1 * embeds2, axis=0) for two [D, N] arrays -> [N]."""
    del rel  # DotProductEdgeDecoder does not distinguish edge types.
    D, N = embeds1.shape
    assert embeds2.shape == (D, N)

    out_dtype = jnp.result_type(embeds1.dtype, embeds2.dtype)
    itemsize = max(jnp.dtype(embeds1.dtype).itemsize,
                   jnp.dtype(embeds2.dtype).itemsize)
    td, tn = _pick_tiles(D, N, itemsize, tn=tn,
                         vmem_budget_bytes=vmem_budget_bytes)
    n_blocks = pl.cdiv(N, tn)
    d_blocks = pl.cdiv(D, td)

    if d_blocks == 1:
        out = pl.pallas_call(
            _dot_kernel_single,
            out_shape=jax.ShapeDtypeStruct((1, N), out_dtype),
            grid_spec=pltpu.PrefetchScalarGridSpec(
                num_scalar_prefetch=0,
                grid=(n_blocks,),
                in_specs=[
                    pl.BlockSpec((D, tn), lambda i: (0, i)),
                    pl.BlockSpec((D, tn), lambda i: (0, i)),
                ],
                out_specs=pl.BlockSpec((1, tn), lambda i: (0, i)),
            ),
            compiler_params=pltpu.CompilerParams(
                dimension_semantics=("parallel",),
                vmem_limit_bytes=32 * 1024 * 1024,
            ),
        )(embeds1, embeds2)
    else:
        kernel = functools.partial(_dot_kernel_tiled, d_total=D, td=td)
        out = pl.pallas_call(
            kernel,
            out_shape=jax.ShapeDtypeStruct((1, N), out_dtype),
            grid_spec=pltpu.PrefetchScalarGridSpec(
                num_scalar_prefetch=0,
                grid=(n_blocks, d_blocks),  # reduction axis (D) last
                in_specs=[
                    pl.BlockSpec((td, tn), lambda i, k: (k, i)),
                    pl.BlockSpec((td, tn), lambda i, k: (k, i)),
                ],
                out_specs=pl.BlockSpec((1, tn), lambda i, k: (0, i)),
                scratch_shapes=[pltpu.VMEM((1, tn), jnp.float32)],
            ),
            compiler_params=pltpu.CompilerParams(
                dimension_semantics=("parallel", "arbitrary"),
                vmem_limit_bytes=32 * 1024 * 1024,
            ),
        )(embeds1, embeds2)

    return out[0]


if __name__ == "__main__":
    key = jax.random.PRNGKey(0)
    k1, k2, k3, k4, k5, k6 = jax.random.split(key, 6)

    # Small shapes consistent with the netquery convention: [embed_dim, batch].
    D, N = 32, 8
    embeds1 = jax.random.normal(k1, (D, N), dtype=jnp.float32)
    embeds2 = jax.random.normal(k2, (D, N), dtype=jnp.float32)
    rel = ("node", "rel", "node")  # ignored, as in the PyTorch module

    out = dot_product_edge_decoder(embeds1, embeds2, rel)
    jax.block_until_ready(out)
    ref = jnp.sum(embeds1 * embeds2, axis=0)
    assert out.shape == (N,)
    assert jnp.allclose(out, ref, atol=1e-5, rtol=1e-5)

    # Check 2: batch not a multiple of the lane tile -> ragged last batch block
    # (no wrapper-side padding) and a multi-step "parallel" grid.
    D2, N2 = 16, 200
    e1b = jax.random.normal(k3, (D2, N2), dtype=jnp.float32)
    e2b = jax.random.normal(k4, (D2, N2), dtype=jnp.float32)
    out2 = dot_product_edge_decoder(e1b, e2b, rel, tn=128)
    jax.block_until_ready(out2)
    ref2 = jnp.sum(e1b * e2b, axis=0)
    assert out2.shape == (N2,)
    assert jnp.allclose(out2, ref2, atol=1e-5, rtol=1e-5)

    # Check 3: force the D-tiled (accumulator) path with a tiny VMEM budget,
    # including a ragged last D block (80 = 32 + 32 + 16) -> masked reduce.
    D3, N3 = 80, 200
    e1c = jax.random.normal(k5, (D3, N3), dtype=jnp.float32)
    e2c = jax.random.normal(k6, (D3, N3), dtype=jnp.float32)
    out3 = dot_product_edge_decoder(e1c, e2c, rel,
                                    vmem_budget_bytes=64 * 1024)
    jax.block_until_ready(out3)
    ref3 = jnp.sum(e1c * e2c, axis=0)
    assert out3.shape == (N3,)
    assert jnp.allclose(out3, ref3, atol=1e-4, rtol=1e-5)

    print("KERNEL_OK")
</pallas_src>

<mosaic_0001>
module attributes {stable_mosaic.version = 11 : i64} {
  func.func @_dot_kernel_single(%arg0: i32, %arg1: memref<32x128xf32, #tpu.memory_space<vmem>>, %arg2: memref<32x128xf32, #tpu.memory_space<vmem>>, %arg3: memref<1x128xf32, #tpu.memory_space<vmem>>) attributes {dimension_semantics = [#tpu.dimension_semantics<parallel>], iteration_bounds = array<i64: 1>, scalar_prefetch = 0 : i64, scratch_operands = 0 : i64, tpu.core_type = #tpu.core_type<tc>, window_params = [{transform_indices = @transform_0, window_bounds = array<i64: 32, 128>}, {transform_indices = @transform_1, window_bounds = array<i64: 32, 128>}, {transform_indices = @transform_2, window_bounds = array<i64: 1, 128>}]} {
    %c0 = arith.constant 0 : index
    %c0_0 = arith.constant 0 : index
    %0 = vector.load %arg1[%c0, %c0_0] : memref<32x128xf32, #tpu.memory_space<vmem>>, vector<32x128xf32>
    %c0_1 = arith.constant 0 : index
    %c0_2 = arith.constant 0 : index
    %1 = vector.load %arg2[%c0_1, %c0_2] : memref<32x128xf32, #tpu.memory_space<vmem>>, vector<32x128xf32>
    %2 = arith.mulf %0, %1 : vector<32x128xf32>
    %cst = arith.constant dense<0.000000e+00> : vector<128xf32>
    %3 = vector.multi_reduction <add>, %2, %cst [0] : vector<32x128xf32> to vector<128xf32>
    %4 = vector.shape_cast %3 : vector<128xf32> to vector<1x128xf32>
    %c0_3 = arith.constant 0 : index
    %c0_4 = arith.constant 0 : index
    %5 = vector.load %arg3[%c0_3, %c0_4] : memref<1x128xf32, #tpu.memory_space<vmem>>, vector<1x128xf32>
    tpu.vector_store %arg3[%c0_3, %c0_4], %4 {strides = array<i32>} : memref<1x128xf32, #tpu.memory_space<vmem>>, vector<1x128xf32>,
    return
  }
  func.func @transform_0(%arg0: i32) -> (i32, i32) {
    %c0_i32 = arith.constant 0 : i32
    %c0_i32_0 = arith.constant 0 : i32
    return %c0_i32, %arg0 : i32, i32
  }
  func.func @transform_1(%arg0: i32) -> (i32, i32) {
    %c0_i32 = arith.constant 0 : i32
    %c0_i32_0 = arith.constant 0 : i32
    return %c0_i32, %arg0 : i32, i32
  }
  func.func @transform_2(%arg0: i32) -> (i32, i32) {
    %c0_i32 = arith.constant 0 : i32
    %c0_i32_0 = arith.constant 0 : i32
    return %c0_i32, %arg0 : i32, i32
  }
}

</mosaic_0001>

<bundles_post_ra>
// kernel: tpu_custom_call.1
= control target key start
LH: loop header
LB: loop body
LE: loop exit
PB: predicated region body
PF: predicated region fallthrough
CT: control target
= control target key end

     0   :  { %s120_s0 = inlined_call_operand.vmem [shape: f32[32,8], index: 0, kind: input, shape index: {}]   ;;  %s121_s1 = inlined_call_operand.vmem [shape: f32[32,8], index: 1, kind: input, shape index: {}]   ;;  %s122_s2 = inlined_call_operand.hbm [shape: f32[1,8], index: 2, kind: output, shape index: {}]  }
   0x1   :  { %v12_v0 = vld [vmem:[%s120_s0] sm:$0xff]  ;;  %v13_v1 = vld [vmem:[%s120_s0 + $0x8] sm:$0xff]  ;;  %v14_v2 = vld [vmem:[%s120_s0 + $0x10] sm:$0xff] }
   0x2   :  { %v15_v3 = vld [vmem:[%s120_s0 + $0x18] sm:$0xff]  ;;  %v16_v4 = vld [vmem:[%s121_s1] sm:$0xff]  ;;  %v17_v5 = vld [vmem:[%s121_s1 + $0x8] sm:$0xff] }
   0x3   :  { %v18_v6 = vld [vmem:[%s121_s1 + $0x10] sm:$0xff]  ;;  %v19_v7 = vld [vmem:[%s121_s1 + $0x18] sm:$0xff]  ;;  %v20_v8 = vmul.f32 %v16_v4, %v12_v0  ;;  %v21_v9 = vmul.f32 %v17_v5, %v13_v1 }
   0x4   :  { %7 = vsyncpa [#allocation3], 0  ;;  %v22_v10 = vmul.f32 %v18_v6, %v14_v2  ;;  %v23_v11 = vmul.f32 %v19_v7, %v15_v3  ;;  %s77_s0 = smov [#allocation2]   ;;  %s41_s28 = sshll.u32 %s122_s2, 4  ;;  %s42_s28 = int_to_ptr.hbm [resolvable:$true] %s41_s28 }
   0x5   :  { %v24_v12 = vadd.f32 %v21_v9, %v20_v8  ;;  %s39_s25 = sshll.u32 %s77_s0, 4  ;;  %s40_s25 = int_to_ptr.vmem [resolvable:$true] %s39_s25 }
   0x7   :  { %v25_v13 = vadd.f32 %v24_v12, %v22_v10 }
   0x9   :  { %v26_v14 = vadd.f32 %v25_v13, %v23_v11 }
   0xb   :  { %v27_v15 = vrot.slane %v26_v14, 4 }
   0xd   :  { %v28_v16 = vadd.f32 %v27_v15, %v26_v14 }
   0xf   :  { %v29_v17 = vrot.slane %v28_v16, 2 }
  0x11   :  { %v30_v18 = vadd.f32 %v29_v17, %v28_v16 }
  0x13   :  { %v31_v19 = vrot.slane %v30_v18, 1 }
  0x15   :  { %v32_v20 = vadd.f32 %v31_v19, %v30_v18 }
  0x17   :  { %33 = vst [vmem:[#allocation2] sm:$0x1] %v32_v20 }
  0x18   :  { %44 = dma.vmem_to_hbm [thread:$0]  %s40_s25, 16, %s42_s28, [#allocation3]  }
  0x19   :  { %75 = dma.done.wait [#allocation3], 16  }
  0x1a   :  { %76 = vsyncadd [#allocation3], 4294967280 }
  0x1b   :  { %49 = vsyncpa [#allocation3], 1 }

</bundles_post_ra>
